<compile_context>
chip_gen: v5e
topology: v5e:2x2
jax: 0.10.0
libtpu: 0.0.40
codegen_flags: <defaults>
</compile_context>

<pallas_src>
import jax
import jax.numpy as jnp
from jax.experimental import pallas as pl
from jax.experimental.pallas import tpu as pltpu


def _make_affine_kernel(row_tile, n_row_tiles, params_resident):
    """Kernel body: o = cast(x_f32 * w + b).

    If params_resident, w_ref/b_ref hold the full (rows_padded, 1) arrays and the
    current row tile is sliced out dynamically (row_tile is 8-aligned whenever
    n_row_tiles > 1).  Otherwise w_ref/b_ref are already (row_tile, 1) blocks.
    """

    def kernel(x_ref, w_ref, b_ref, o_ref):
        if params_resident and n_row_tiles > 1:
            start = pl.multiple_of(pl.program_id(0) * row_tile, row_tile)
            w = w_ref[pl.ds(start, row_tile), :]
            b = b_ref[pl.ds(start, row_tile), :]
        else:
            w = w_ref[...]
            b = b_ref[...]
        x = x_ref[...].astype(jnp.float32)
        o_ref[...] = (x * w + b).astype(o_ref.dtype)

    return kernel


def global_layer_norm(x, weight, bias, *, eps=1e-5, running_mean=0, running_var=1):
    """Eval-path GlobalLayerNormalization.

    x: (B, C, T); weight, bias: (C, 1) or (1, C, 1).
    running_mean / running_var may be Python scalars or arrays broadcastable to (C, 1).
    Returns (B, C, T) with x.dtype.
    """
    B, C, T = x.shape
    f32 = jnp.float32

    # ---- fold running stats into the per-channel affine, in float32 -------------
    w = jnp.asarray(weight, f32).reshape(C, 1)
    b = jnp.asarray(bias, f32).reshape(C, 1)
    rm = jnp.asarray(running_mean, f32)
    rv = jnp.asarray(running_var, f32)
    if rm.ndim == 3:
        rm = rm.reshape(-1, 1)
    if rv.ndim == 3:
        rv = rv.reshape(-1, 1)

    inv_std = 1.0 / jnp.sqrt(rv + jnp.asarray(eps, f32))
    w_eff = w * inv_std                 # (C, 1) f32
    b_eff = b - rm * w_eff              # (C, 1) f32

    rows = B * C
    x2 = x.reshape(rows, T)                                             # row-major, free
    w_rows = jnp.broadcast_to(w_eff[None], (B, C, 1)).reshape(rows, 1)  # tiny
    b_rows = jnp.broadcast_to(b_eff[None], (B, C, 1)).reshape(rows, 1)  # tiny

    itemsize = jnp.dtype(x.dtype).itemsize

    # ---- tile selection: size blocks by BYTES, lane axis first ------------------
    BLOCK_BYTES = 8 * 1024 * 1024   # ~8 MiB/block -> ~32 MiB in+out double-buffered
    T_CAP = 4096                    # lane-axis tile cap (elements)

    if T <= 128:
        t_tile = T                                   # full (small) lane extent
    elif T <= T_CAP:
        # keep the steady state lane-dense: largest multiple of 128 <= T
        t_tile = T if T % 128 == 0 else (T // 128) * 128
    else:
        t_tile = T_CAP

    row_cap = max(8, (BLOCK_BYTES // (t_tile * itemsize)) // 8 * 8)
    row_tile = min(rows, row_cap)
    if row_tile < rows:
        row_tile = max(8, (row_tile // 8) * 8)       # 8-aligned unless full-rows block

    grid = (pl.cdiv(rows, row_tile), pl.cdiv(T, t_tile))
    # (v7x note: both axes are "parallel"; an even tile count on the sharded axis is
    #  slightly better for 2-TC balance, but correctness never depends on it.)

    # ---- params: fully resident (DMA'd once) when tiny, else per-row-tile blocks --
    rows_padded = grid[0] * row_tile
    # a (rows_padded, 1) f32 array occupies rows_padded*512 bytes of VMEM per buffer
    params_resident = (2 * rows_padded * 512) <= (2 << 20)
    if params_resident:
        if rows_padded != rows:
            pad = rows_padded - rows
            w_rows = jnp.pad(w_rows, ((0, pad), (0, 0)))
            b_rows = jnp.pad(b_rows, ((0, pad), (0, 0)))
        w_spec = pl.BlockSpec((rows_padded, 1), lambda r, t: (0, 0))
        b_spec = pl.BlockSpec((rows_padded, 1), lambda r, t: (0, 0))
    else:
        # re-DMA'd only when r changes (t is the inner grid axis) -- still tiny
        w_spec = pl.BlockSpec((row_tile, 1), lambda r, t: (r, 0))
        b_spec = pl.BlockSpec((row_tile, 1), lambda r, t: (r, 0))

    cost = pl.CostEstimate(
        flops=2 * rows * T,
        transcendentals=0,
        bytes_accessed=2 * rows * T * itemsize + 2 * rows * 4,
    )

    out2 = pl.pallas_call(
        _make_affine_kernel(row_tile, grid[0], params_resident),
        out_shape=jax.ShapeDtypeStruct((rows, T), x.dtype),
        grid=grid,
        in_specs=[
            pl.BlockSpec((row_tile, t_tile), lambda r, t: (r, t)),
            w_spec,
            b_spec,
        ],
        out_specs=pl.BlockSpec((row_tile, t_tile), lambda r, t: (r, t)),
        compiler_params=pltpu.CompilerParams(
            dimension_semantics=("parallel", "parallel"),
            vmem_limit_bytes=48 * 1024 * 1024,   # safe on v7x (64 MiB), raises v5e/v6e defaults
        ),
        cost_estimate=cost,
    )(x2, w_rows, b_rows)

    return out2.reshape(B, C, T)


if __name__ == "__main__":
    B, C, T = 2, 4, 16
    eps = 1e-5

    key = jax.random.PRNGKey(0)
    kx, kw, kb = jax.random.split(key, 3)
    x = jax.random.normal(kx, (B, C, T), dtype=jnp.float32)
    # Parameters have module shape (1, C, 1); stored here as (C, 1).
    weight = jax.random.normal(kw, (C, 1), dtype=jnp.float32)
    bias = jax.random.normal(kb, (C, 1), dtype=jnp.float32)

    y = global_layer_norm(x, weight, bias, eps=eps)
    y = jax.block_until_ready(y)

    # Pure-JAX reference (eval-path semantics of the PyTorch module).
    running_mean, running_var = 0.0, 1.0
    ref = weight[None] * (x - running_mean) / jnp.sqrt(running_var + eps) + bias[None]

    assert y.shape == (B, C, T)
    assert jnp.allclose(y, ref, atol=1e-5, rtol=1e-5), "mismatch vs reference"
    print("KERNEL_OK")
</pallas_src>

<mosaic_0001>
module attributes {stable_mosaic.version = 11 : i64} {
  func.func @kernel(%arg0: i32, %arg1: i32, %arg2: memref<8x16xf32, #tpu.memory_space<vmem>>, %arg3: memref<8x1xf32, #tpu.memory_space<vmem>>, %arg4: memref<8x1xf32, #tpu.memory_space<vmem>>, %arg5: memref<8x16xf32, #tpu.memory_space<vmem>>) attributes {dimension_semantics = [#tpu.dimension_semantics<parallel>, #tpu.dimension_semantics<parallel>], iteration_bounds = array<i64: 1, 1>, scalar_prefetch = 0 : i64, scratch_operands = 0 : i64, tpu.core_type = #tpu.core_type<tc>, window_params = [{transform_indices = @transform_0, window_bounds = array<i64: 8, 16>}, {pipeline_mode = #tpu.pipeline_mode<synchronous>, transform_indices = @transform_1, window_bounds = array<i64: 8, 1>}, {pipeline_mode = #tpu.pipeline_mode<synchronous>, transform_indices = @transform_2, window_bounds = array<i64: 8, 1>}, {transform_indices = @transform_3, window_bounds = array<i64: 8, 16>}]} {
    %c0 = arith.constant 0 : index
    %c0_0 = arith.constant 0 : index
    %0 = vector.load %arg3[%c0, %c0_0] : memref<8x1xf32, #tpu.memory_space<vmem>>, vector<8x1xf32>
    %c0_1 = arith.constant 0 : index
    %c0_2 = arith.constant 0 : index
    %1 = vector.load %arg4[%c0_1, %c0_2] : memref<8x1xf32, #tpu.memory_space<vmem>>, vector<8x1xf32>
    %c0_3 = arith.constant 0 : index
    %c0_4 = arith.constant 0 : index
    %2 = vector.load %arg2[%c0_3, %c0_4] : memref<8x16xf32, #tpu.memory_space<vmem>>, vector<8x16xf32>
    %3 = vector.broadcast %0 : vector<8x1xf32> to vector<8x16xf32>
    %4 = arith.mulf %2, %3 : vector<8x16xf32>
    %5 = vector.broadcast %1 : vector<8x1xf32> to vector<8x16xf32>
    %6 = arith.addf %4, %5 : vector<8x16xf32>
    %c0_5 = arith.constant 0 : index
    %c0_6 = arith.constant 0 : index
    %7 = vector.load %arg5[%c0_5, %c0_6] : memref<8x16xf32, #tpu.memory_space<vmem>>, vector<8x16xf32>
    tpu.vector_store %arg5[%c0_5, %c0_6], %6 {strides = array<i32>} : memref<8x16xf32, #tpu.memory_space<vmem>>, vector<8x16xf32>,
    return
  }
  func.func @transform_0(%arg0: i32, %arg1: i32) -> (i32, i32) {
    %c0_i32 = arith.constant 0 : i32
    return %arg0, %arg1 : i32, i32
  }
  func.func @transform_1(%arg0: i32, %arg1: i32) -> (i32, i32) {
    %c0_i32 = arith.constant 0 : i32
    %c0_i32_0 = arith.constant 0 : i32
    %c0_i32_1 = arith.constant 0 : i32
    return %c0_i32, %c0_i32_0 : i32, i32
  }
  func.func @transform_2(%arg0: i32, %arg1: i32) -> (i32, i32) {
    %c0_i32 = arith.constant 0 : i32
    %c0_i32_0 = arith.constant 0 : i32
    %c0_i32_1 = arith.constant 0 : i32
    return %c0_i32, %c0_i32_0 : i32, i32
  }
  func.func @transform_3(%arg0: i32, %arg1: i32) -> (i32, i32) {
    %c0_i32 = arith.constant 0 : i32
    return %arg0, %arg1 : i32, i32
  }
}

</mosaic_0001>

<bundles_post_ra>
// kernel: tpu_custom_call.1
= control target key start
LH: loop header
LB: loop body
LE: loop exit
PB: predicated region body
PF: predicated region fallthrough
CT: control target
= control target key end

     0   :  { %v77_v1 = vmov 0   ;;  %s111_s0 = inlined_call_operand.vmem [shape: f32[8,16], index: 0, kind: input, shape index: {}]   ;;  %s112_s1 = inlined_call_operand.vmem [shape: f32[8,1], index: 1, kind: input, shape index: {}]   ;;  %s113_s2 = inlined_call_operand.vmem [shape: f32[8,1], index: 2, kind: input, shape index: {}]   ;;  %s114_s3 = inlined_call_operand.hbm [shape: f32[8,16], index: 3, kind: output, shape index: {}]  }
   0x1   :  { %v15_v0 = vld [vmem:[%s112_s1] sm:$0xff]  ;;  %50 = vset.pattern.permute.xlu0 %v77_v1 }
   0x2   :  { %8 = vsyncpa [#allocation3], 0  ;;  %20 = vperm.xlu0 %50, %v15_v0   ;;  %v16_v2 = vld [vmem:[%s113_s2] sm:$0xff]  ;;  %s78_s18 = smov [#allocation2]   ;;  %s39_s1 = sshll.u32 %s114_s3, 4  ;;  %vm30_vm0 = vcmask 130048   ;;  %s40_s1 = int_to_ptr.hbm [resolvable:$true] %s39_s1 }
   0x3   :  { %v17_v4 = vld [vmem:[%s111_s0] sm:$0xff]  ;;  %s37_s19 = sshll.u32 %s78_s18, 4  ;;  %s38_s19 = int_to_ptr.vmem [resolvable:$true] %s37_s19 }
   0xa   :  { %26 = vperm.xlu0 %50, %v16_v2  }
  0x74   :  { %v21_v3 = vpop.permute.xlu0 %20 }
  0x75   :  { %v23_v5 = vmul.f32 %v21_v3, %v17_v4 }
  0x7c   :  { %v27_v6 = vpop.permute.xlu0 %26 }
  0x7d   :  { %v29_v7 = vadd.f32 %v27_v6, %v23_v5 }
  0x7f   :  { %31 = vst.msk [vmem:[#allocation2] sm:$0xff] %vm30_vm0, %v29_v7 }
  0x80   :  { %42 = dma.vmem_to_hbm [thread:$0]  %s38_s19, 128, %s40_s1, [#allocation3]  }
  0x81   :  { %75 = dma.done.wait [#allocation3], 128  }
  0x82   :  { %76 = vsyncadd [#allocation3], 4294967168 }
  0x83   :  { %47 = vsyncpa [#allocation3], 1 }

</bundles_post_ra>
